<compile_context>
chip_gen: v6e
topology: v6e:2x2x1
jax: 0.10.0
libtpu: 0.0.40
codegen_flags: <defaults>
</compile_context>

<pallas_src>
import functools

import jax
import jax.numpy as jnp
from jax import lax
from jax.experimental import pallas as pl
from jax.experimental.pallas import tpu as pltpu


def _round_up(x, m):
    return m * pl.cdiv(x, m)


def _policy_kernel(canv_ref, w_hid_ref, b_hid_ref, w_head_ref, b_head_ref,
                   out_ref, *, n_params):
    # Fused hidden layer: z = relu(canv @ [w1|wv|0] + [b1|bv|0])  (lane-dense 128)
    z = jnp.dot(canv_ref[...], w_hid_ref[...],
                preferred_element_type=jnp.float32) + b_hid_ref[...]
    z = jnp.maximum(z, 0.0)                                # (TILE_B, 128)

    # Fused heads: block-diagonal [[wmu, wsig, 0], [0, 0, wV], [0, 0, 0]]
    # (128x128) -> one lane-dense logits tile.
    logits = jnp.dot(z, w_head_ref[...],
                     preferred_element_type=jnp.float32) + b_head_ref[...]

    # Per-column-segment transforms with ONE fused sigmoid pass:
    #   col <  P      : mu    = 0.01 + 0.98 * sigmoid(logits)
    #   P <= col < 2P : sigma = sigmoid(logits - 5.0)
    #   col == 2P     : V     = logits
    #   col >  2P     : padding (logits == 0, sliced away in the wrapper)
    P = n_params
    col = lax.broadcasted_iota(jnp.int32, logits.shape, 1)
    is_mu = col < P
    is_sig = jnp.logical_and(col >= P, col < 2 * P)
    s = jax.nn.sigmoid(logits - jnp.where(is_sig, 5.0, 0.0))
    out = jnp.where(is_mu, 0.01 + 0.98 * s, jnp.where(is_sig, s, logits))
    out_ref[...] = out.astype(out_ref.dtype)


def fuse_params(params, io_dtype=jnp.float32):
    """Build fused (lane-padded) weights/biases ONCE.

    io_dtype controls the *streaming* dtype (canv / w_hid / padded output).
    Accumulation stays f32 in the kernel. bf16 halves HBM traffic on this
    memory-bound kernel at the cost of ~1e-3-level deviations from f32.
    """
    w1, b1 = params["w1"], params["b1"]        # (F, H), (1, H)
    wv, bv = params["wv"], params["bv"]        # (F, H), (1, H)
    wmu, bmu = params["wmu"], params["bmu"]    # (H, P), (1, P)
    wsig, bsig = params["wsig"], params["bsig"]
    wV, bV = params["wV"], params["bV"]        # (H, 1), (1, 1)

    F, H = w1.shape
    P = wmu.shape[1]
    out_dim = 2 * P + 1
    out_pad = _round_up(out_dim, 128)          # lane-dense output width
    hid_pad = _round_up(2 * H, 128)            # lane-dense hidden width

    # Hidden stage: canv @ [w1 | wv | 0]  -> z = [x | y | 0]
    w_hid = jnp.zeros((F, hid_pad), jnp.float32)
    w_hid = w_hid.at[:, :H].set(w1)
    w_hid = w_hid.at[:, H:2 * H].set(wv)
    b_hid = jnp.zeros((1, hid_pad), jnp.float32)
    b_hid = b_hid.at[:, :H].set(b1)
    b_hid = b_hid.at[:, H:2 * H].set(bv)

    # Head stage: block-diagonal [[wmu, wsig, 0], [0, 0, wV], [0, 0, 0]]
    w_head = jnp.zeros((hid_pad, out_pad), jnp.float32)
    w_head = w_head.at[:H, :P].set(wmu)
    w_head = w_head.at[:H, P:2 * P].set(wsig)
    w_head = w_head.at[H:2 * H, 2 * P:2 * P + 1].set(wV)
    b_head = jnp.zeros((1, out_pad), jnp.float32)
    b_head = b_head.at[:, :P].set(bmu)
    b_head = b_head.at[:, P:2 * P].set(bsig)
    b_head = b_head.at[:, 2 * P:2 * P + 1].set(bV)

    return dict(
        w_hid=w_hid.astype(io_dtype),     # streamed / MXU input
        b_hid=b_hid,                      # f32 (added to f32 accumulator)
        w_head=w_head,                    # f32, VMEM-resident, compute is tiny
        b_head=b_head,
        n_params=P, out_pad=out_pad, hid_pad=hid_pad,
        io_dtype=jnp.dtype(io_dtype),
    )


def _xla_forward(canv_flat, fused):
    """Tiny-batch fallback: plain XLA, same fused math."""
    P = fused["n_params"]
    z = jax.nn.relu(canv_flat @ fused["w_hid"].astype(jnp.float32)
                    + fused["b_hid"])
    logits = z @ fused["w_head"] + fused["b_head"]
    return {
        "params_mu": 0.01 + 0.98 * jax.nn.sigmoid(logits[:, :P]),
        "params_sigma": jax.nn.sigmoid(logits[:, P:2 * P] - 5.0),
        "V_params": logits[:, 2 * P:2 * P + 1],
    }


def policy_nn_params_forward(canv, fused, *, min_pallas_batch=16):
    """canv: (B, N_side, N_side).  fused: output of fuse_params()."""
    B = canv.shape[0]
    n_flat = canv.shape[1] * canv.shape[2]
    io_dtype = fused["io_dtype"]
    canv_flat = canv.reshape(B, n_flat).astype(io_dtype)

    # Tiny batches: launch + single-step grid overhead dominates; let XLA fuse.
    if B < min_pallas_batch:
        return _xla_forward(canv_flat, fused)

    w_hid, b_hid = fused["w_hid"], fused["b_hid"]
    w_head, b_head = fused["w_head"], fused["b_head"]
    P = fused["n_params"]
    out_pad = fused["out_pad"]

    # Batch tiling.  Kernel is HBM / per-step-overhead bound:
    #   * large tiles (up to 1024 rows) amortize the ~0.35us/step overhead
    #     (double-buffered footprint <= ~3 MiB, fine on v5e/v6e/v7x),
    #   * for large B always keep >= 2 grid steps so "parallel" shards across
    #     both TensorCores on v7x.
    if B <= 512:
        tile_b = B                      # single step; block == full array dims
    else:
        tile_b = min(1024, _round_up(pl.cdiv(B, 2), 8))
    b_padded = _round_up(B, tile_b)
    if b_padded != B:
        canv_flat = jnp.pad(canv_flat, ((0, b_padded - B), (0, 0)))
    grid = (b_padded // tile_b,)

    kernel = functools.partial(_policy_kernel, n_params=P)

    itemsize = jnp.dtype(io_dtype).itemsize
    cost = pl.CostEstimate(
        flops=2 * b_padded * (n_flat * w_hid.shape[1]
                              + w_hid.shape[1] * out_pad),
        transcendentals=b_padded * out_pad,
        bytes_accessed=(b_padded * n_flat * itemsize            # canv stream
                        + b_padded * out_pad * itemsize          # output stream
                        + w_hid.size * itemsize
                        + (b_hid.size + w_head.size + b_head.size) * 4),
    )

    out = pl.pallas_call(
        kernel,
        out_shape=jax.ShapeDtypeStruct((b_padded, out_pad), io_dtype),
        grid_spec=pltpu.PrefetchScalarGridSpec(
            num_scalar_prefetch=0,
            grid=grid,
            in_specs=[
                pl.BlockSpec((tile_b, n_flat), lambda i: (i, 0)),   # canv
                pl.BlockSpec(w_hid.shape, lambda i: (0, 0)),        # [w1|wv|0]
                pl.BlockSpec(b_hid.shape, lambda i: (0, 0)),        # [b1|bv|0]
                pl.BlockSpec(w_head.shape, lambda i: (0, 0)),       # head W
                pl.BlockSpec(b_head.shape, lambda i: (0, 0)),       # head b
            ],
            out_specs=pl.BlockSpec((tile_b, out_pad), lambda i: (i, 0)),
        ),
        compiler_params=pltpu.CompilerParams(
            dimension_semantics=("parallel",)),
        cost_estimate=cost,
    )(canv_flat, w_hid, b_hid, w_head, b_head)

    out = out[:B].astype(jnp.float32)
    return {
        "params_mu": out[:, :P],
        "params_sigma": out[:, P:2 * P],
        "V_params": out[:, 2 * P:2 * P + 1],
    }


def init_params(key, n_flat, n_hidden, n_params):
    ks = jax.random.split(key, 10)

    def linear(kw, kb, fan_in, fan_out):
        # torch nn.Linear default init: U(-1/sqrt(fan_in), 1/sqrt(fan_in))
        bound = 1.0 / jnp.sqrt(fan_in)
        w = jax.random.uniform(kw, (fan_in, fan_out), jnp.float32, -bound, bound)
        b = jax.random.uniform(kb, (1, fan_out), jnp.float32, -bound, bound)
        return w, b

    w1, b1 = linear(ks[0], ks[1], n_flat, n_hidden)        # layer_1
    wv, bv = linear(ks[2], ks[3], n_flat, n_hidden)        # layer_V
    wmu, bmu = linear(ks[4], ks[5], n_hidden, n_params)    # params_out_mu
    wsig, bsig = linear(ks[6], ks[7], n_hidden, n_params)  # params_out_sigma
    wV, bV = linear(ks[8], ks[9], n_hidden, 1)             # V_params
    return dict(w1=w1, b1=b1, wv=wv, bv=bv, wmu=wmu, bmu=bmu,
                wsig=wsig, bsig=bsig, wV=wV, bV=bV)


def reference_forward(canv, p):
    B = canv.shape[0]
    cf = canv.reshape(B, -1)
    x = jax.nn.relu(cf @ p["w1"] + p["b1"])
    y = jax.nn.relu(cf @ p["wv"] + p["bv"])
    mu = 0.01 + 0.98 * jax.nn.sigmoid(x @ p["wmu"] + p["bmu"])
    sig = jax.nn.sigmoid(x @ p["wsig"] + p["bsig"] - 5.0)
    v = y @ p["wV"] + p["bV"]
    return {"params_mu": mu, "params_sigma": sig, "V_params": v}


def _check(out, ref, atol, rtol, tag):
    for name in ("params_mu", "params_sigma", "V_params"):
        assert out[name].shape == ref[name].shape, (tag, name)
        assert jnp.allclose(out[name], ref[name], atol=atol, rtol=rtol), (tag, name)


if __name__ == "__main__":
    # Small shapes consistent with the module: N_side=16 -> N_flat=256,
    # N_hidden=32, N_params=8.
    N_side, N_hidden, N_params = 16, 32, 8
    key = jax.random.PRNGKey(0)
    k_small, k_big, k_params = jax.random.split(key, 3)

    params = init_params(k_params, N_side * N_side, N_hidden, N_params)
    fused_f32 = jax.tree_util.tree_map(
        jax.block_until_ready, fuse_params(params, io_dtype=jnp.float32))

    # 1) Tiny batch (B=2), force the Pallas path so the kernel is exercised.
    canv_small = jax.random.uniform(k_small, (2, N_side, N_side), jnp.float32)
    out_small = policy_nn_params_forward(canv_small, fused_f32,
                                         min_pallas_batch=0)
    out_small = jax.tree_util.tree_map(jax.block_until_ready, out_small)
    _check(out_small, reference_forward(canv_small, params),
           atol=1e-5, rtol=1e-5, tag="f32_small")

    # 2) Larger batch (B=640) -> 2-step parallel grid (tile_b=320), f32 path.
    canv_big = jax.random.uniform(k_big, (640, N_side, N_side), jnp.float32)
    out_big = policy_nn_params_forward(canv_big, fused_f32)
    out_big = jax.tree_util.tree_map(jax.block_until_ready, out_big)
    ref_big = reference_forward(canv_big, params)
    _check(out_big, ref_big, atol=1e-5, rtol=1e-5, tag="f32_big")

    # 3) bf16 streaming path (halves HBM traffic); looser tolerance vs f32 ref.
    fused_bf16 = jax.tree_util.tree_map(
        jax.block_until_ready, fuse_params(params, io_dtype=jnp.bfloat16))
    out_bf16 = policy_nn_params_forward(canv_big, fused_bf16)
    out_bf16 = jax.tree_util.tree_map(jax.block_until_ready, out_bf16)
    _check(out_bf16, ref_big, atol=5e-2, rtol=5e-2, tag="bf16_big")

    # TODO(synk): conv_layer_input=True branch (3x conv + maxpool, two towers),
    # NN_type='two_layer'/'linear' and tanh nonlinearity are not implemented;
    # this kernel covers the default MLP ('one_layer', relu) forward path.
    print("KERNEL_OK")
</pallas_src>

<mosaic_0001>
module attributes {stable_mosaic.version = 11 : i64} {
  func.func @_policy_kernel(%arg0: i32, %arg1: memref<2x256xf32, #tpu.memory_space<vmem>>, %arg2: memref<256x128xf32, #tpu.memory_space<vmem>>, %arg3: memref<1x128xf32, #tpu.memory_space<vmem>>, %arg4: memref<128x128xf32, #tpu.memory_space<vmem>>, %arg5: memref<1x128xf32, #tpu.memory_space<vmem>>, %arg6: memref<2x128xf32, #tpu.memory_space<vmem>>) attributes {dimension_semantics = [#tpu.dimension_semantics<parallel>], iteration_bounds = array<i64: 1>, scalar_prefetch = 0 : i64, scratch_operands = 0 : i64, tpu.core_type = #tpu.core_type<tc>, window_params = [{transform_indices = @transform_0, window_bounds = array<i64: 2, 256>}, {pipeline_mode = #tpu.pipeline_mode<synchronous>, transform_indices = @transform_1, window_bounds = array<i64: 256, 128>}, {pipeline_mode = #tpu.pipeline_mode<synchronous>, transform_indices = @transform_2, window_bounds = array<i64: 1, 128>}, {pipeline_mode = #tpu.pipeline_mode<synchronous>, transform_indices = @transform_3, window_bounds = array<i64: 128, 128>}, {pipeline_mode = #tpu.pipeline_mode<synchronous>, transform_indices = @transform_4, window_bounds = array<i64: 1, 128>}, {transform_indices = @transform_5, window_bounds = array<i64: 2, 128>}]} {
    %c0 = arith.constant 0 : index
    %c0_0 = arith.constant 0 : index
    %0 = vector.load %arg1[%c0, %c0_0] : memref<2x256xf32, #tpu.memory_space<vmem>>, vector<2x256xf32>
    %c0_1 = arith.constant 0 : index
    %c0_2 = arith.constant 0 : index
    %1 = vector.load %arg2[%c0_1, %c0_2] : memref<256x128xf32, #tpu.memory_space<vmem>>, vector<256x128xf32>
    %cst = arith.constant dense<0.000000e+00> : vector<2x128xf32>
    %2 = tpu.matmul %0, %1, %cst {dimension_numbers = #tpu.dot_dimension_numbers<[1], [0], [0], [1], [0, 0, 1, 1], [], []>} : vector<2x256xf32>, vector<256x128xf32>, vector<2x128xf32> -> vector<2x128xf32>
    %c0_3 = arith.constant 0 : index
    %c0_4 = arith.constant 0 : index
    %3 = vector.load %arg3[%c0_3, %c0_4] : memref<1x128xf32, #tpu.memory_space<vmem>>, vector<1x128xf32>
    %4 = vector.broadcast %3 : vector<1x128xf32> to vector<2x128xf32>
    %5 = arith.addf %2, %4 : vector<2x128xf32>
    %cst_5 = arith.constant 0.000000e+00 : f32
    %6 = vector.broadcast %cst_5 : f32 to vector<2x128xf32>
    %7 = arith.maximumf %5, %6 : vector<2x128xf32>
    %c0_6 = arith.constant 0 : index
    %c0_7 = arith.constant 0 : index
    %8 = vector.load %arg4[%c0_6, %c0_7] : memref<128x128xf32, #tpu.memory_space<vmem>>, vector<128x128xf32>
    %cst_8 = arith.constant dense<0.000000e+00> : vector<2x128xf32>
    %9 = tpu.matmul %7, %8, %cst_8 {dimension_numbers = #tpu.dot_dimension_numbers<[1], [0], [0], [1], [0, 0, 1, 1], [], []>} : vector<2x128xf32>, vector<128x128xf32>, vector<2x128xf32> -> vector<2x128xf32>
    %c0_9 = arith.constant 0 : index
    %c0_10 = arith.constant 0 : index
    %10 = vector.load %arg5[%c0_9, %c0_10] : memref<1x128xf32, #tpu.memory_space<vmem>>, vector<1x128xf32>
    %11 = vector.broadcast %10 : vector<1x128xf32> to vector<2x128xf32>
    %12 = arith.addf %9, %11 : vector<2x128xf32>
    %13 = tpu.iota {dimensions = array<i32: 1>} : vector<2x128xi32>
    %c8_i32 = arith.constant 8 : i32
    %14 = vector.broadcast %c8_i32 : i32 to vector<2x128xi32>
    %15 = arith.cmpi slt, %13, %14 : vector<2x128xi32>
    %c8_i32_11 = arith.constant 8 : i32
    %16 = vector.broadcast %c8_i32_11 : i32 to vector<2x128xi32>
    %17 = arith.cmpi sge, %13, %16 : vector<2x128xi32>
    %c16_i32 = arith.constant 16 : i32
    %18 = vector.broadcast %c16_i32 : i32 to vector<2x128xi32>
    %19 = arith.cmpi slt, %13, %18 : vector<2x128xi32>
    %20 = arith.andi %17, %19 : vector<2x128xi1>
    %cst_12 = arith.constant 5.000000e+00 : f32
    %cst_13 = arith.constant 0.000000e+00 : f32
    %21 = vector.broadcast %cst_12 : f32 to vector<2x128xf32>
    %22 = vector.broadcast %cst_13 : f32 to vector<2x128xf32>
    %23 = arith.select %20, %21, %22 : vector<2x128xi1>, vector<2x128xf32>
    %24 = arith.subf %12, %23 : vector<2x128xf32>
    %25 = arith.negf %24 : vector<2x128xf32>
    %26 = math.exp %25 : vector<2x128xf32>
    %cst_14 = arith.constant 1.000000e+00 : f32
    %27 = vector.broadcast %cst_14 : f32 to vector<2x128xf32>
    %28 = arith.addf %27, %26 : vector<2x128xf32>
    %29 = arith.divf %27, %28 : vector<2x128xf32>
    %cst_15 = arith.constant 9.800000e-01 : f32
    %30 = vector.broadcast %cst_15 : f32 to vector<2x128xf32>
    %31 = arith.mulf %30, %29 : vector<2x128xf32>
    %cst_16 = arith.constant 0.00999999977 : f32
    %32 = vector.broadcast %cst_16 : f32 to vector<2x128xf32>
    %33 = arith.addf %32, %31 : vector<2x128xf32>
    %34 = arith.select %20, %29, %12 : vector<2x128xi1>, vector<2x128xf32>
    %35 = arith.select %15, %33, %34 : vector<2x128xi1>, vector<2x128xf32>
    %c0_17 = arith.constant 0 : index
    %c0_18 = arith.constant 0 : index
    %36 = vector.load %arg6[%c0_17, %c0_18] : memref<2x128xf32, #tpu.memory_space<vmem>>, vector<2x128xf32>
    tpu.vector_store %arg6[%c0_17, %c0_18], %35 {strides = array<i32>} : memref<2x128xf32, #tpu.memory_space<vmem>>, vector<2x128xf32>,
    return
  }
  func.func @transform_0(%arg0: i32) -> (i32, i32) {
    %c0_i32 = arith.constant 0 : i32
    %c0_i32_0 = arith.constant 0 : i32
    return %arg0, %c0_i32 : i32, i32
  }
  func.func @transform_1(%arg0: i32) -> (i32, i32) {
    %c0_i32 = arith.constant 0 : i32
    %c0_i32_0 = arith.constant 0 : i32
    %c0_i32_1 = arith.constant 0 : i32
    return %c0_i32, %c0_i32_0 : i32, i32
  }
  func.func @transform_2(%arg0: i32) -> (i32, i32) {
    %c0_i32 = arith.constant 0 : i32
    %c0_i32_0 = arith.constant 0 : i32
    %c0_i32_1 = arith.constant 0 : i32
    return %c0_i32, %c0_i32_0 : i32, i32
  }
  func.func @transform_3(%arg0: i32) -> (i32, i32) {
    %c0_i32 = arith.constant 0 : i32
    %c0_i32_0 = arith.constant 0 : i32
    %c0_i32_1 = arith.constant 0 : i32
    return %c0_i32, %c0_i32_0 : i32, i32
  }
  func.func @transform_4(%arg0: i32) -> (i32, i32) {
    %c0_i32 = arith.constant 0 : i32
    %c0_i32_0 = arith.constant 0 : i32
    %c0_i32_1 = arith.constant 0 : i32
    return %c0_i32, %c0_i32_0 : i32, i32
  }
  func.func @transform_5(%arg0: i32) -> (i32, i32) {
    %c0_i32 = arith.constant 0 : i32
    %c0_i32_0 = arith.constant 0 : i32
    return %arg0, %c0_i32 : i32, i32
  }
}

</mosaic_0001>

<bundles_post_ra>
// kernel: tpu_custom_call.1
= control target key start
LH: loop header
LB: loop body
LE: loop exit
PB: predicated region body
PF: predicated region fallthrough
CT: control target
= control target key end

     0   :  { %10 = vsyncpa [#allocation3], 0  ;;  %s586_s0 = inlined_call_operand.hbm [shape: f32[2,256], index: 0, kind: input, shape index: {}]   ;;  %s587_s1 = inlined_call_operand.hbm [shape: f32[256,128], index: 1, kind: input, shape index: {}]   ;;  %s588_s2 = inlined_call_operand.vmem [shape: f32[1,128], index: 2, kind: input, shape index: {}]   ;;  %s589_s3 = inlined_call_operand.hbm [shape: f32[128,128], index: 3, kind: input, shape index: {}]   ;;  %s590_s4 = inlined_call_operand.vmem [shape: f32[1,128], index: 4, kind: input, shape index: {}]   ;;  %s591_s5 = inlined_call_operand.hbm [shape: f32[2,128], index: 5, kind: output, shape index: {}]  }
   0x1   :  { %11 = vsyncpa [#allocation6], 0 }
   0x2   :  { %12 = vsyncpa [#allocation4], 0  ;;  %s499_s18 = smov [#allocation5]  }
   0x3   :  { %s28_s19 = sshll.u32 %s499_s18, 4  ;;  %s29_s19 = int_to_ptr.vmem [resolvable:$true] %s28_s19 }
   0x4   :  { %s421_s20 = scalar_lea.vmem %s29_s19, 4096  ;;  %p426_p1 = scmp.lt.s32.totalorder %s29_s19, %s29_s19 }
   0x5   :  { %p422_p0 = scmp.ne.s32.totalorder %s29_s19, %s421_s20  ;;  %p427_p2 = scmp.lt.s32.totalorder %s421_s20, %s421_s20 }
   0x7   :  { %p428_p3 = por %p427_p2, %p426_p1 }
   0x9   :  { %p429_p4 = pnand %p428_p3, %p422_p0 }
   0xb   :  { %432 = shalt.err (!%p429_p4)
}
   0xc   :  { %s500_s21 = smov 128   ;;  %s501_s22 = smov 8  }
   0xd   :  { %34 = dma.hbm_to_vmem [thread:$0]  %s587_s1, 4096, %s29_s19, [#allocation6], %s500_s21, %s500_s21, %s501_s22  }
   0xe   :  { %s502_s25 = smov [#allocation2]   ;;  %s503_s27 = smov [#allocation7]  }
   0xf   :  { %s19_s26 = sshll.u32 %s502_s25, 4  ;;  %s42_s28 = sshll.u32 %s503_s27, 4  ;;  %s20_s26 = int_to_ptr.vmem [resolvable:$true] %s19_s26  ;;  %s43_s28 = int_to_ptr.vmem [resolvable:$true] %s42_s28 }
  0x10   :  { %s441_s29 = scalar_lea.vmem %s20_s26, 64  ;;  %p446_p6 = scmp.lt.s32.totalorder %s20_s26, %s20_s26 }
  0x11   :  { %p442_p5 = scmp.ne.s32.totalorder %s20_s26, %s441_s29  ;;  %p447_p7 = scmp.lt.s32.totalorder %s441_s29, %s441_s29 }
  0x13   :  { %p448_p8 = por %p447_p7, %p446_p6 }
  0x15   :  { %p449_p9 = pnand %p448_p8, %p442_p5 }
  0x17   :  { %452 = shalt.err (!%p449_p9)
}
  0x18   :  { %22 = dma.hbm_to_vmem [thread:$0]  %s586_s0, 64, %s20_s26, [#allocation3]  }
  0x19   :  { %s461_s7 = scalar_lea.vmem %s43_s28, 2048  ;;  %p466_p11 = scmp.lt.s32.totalorder %s43_s28, %s43_s28 }
  0x1a   :  { %p462_p10 = scmp.ne.s32.totalorder %s43_s28, %s461_s7  ;;  %p467_p12 = scmp.lt.s32.totalorder %s461_s7, %s461_s7 }
  0x1c   :  { %p468_p13 = por %p467_p12, %p466_p11 }
  0x1e   :  { %p469_p0 = pnand %p468_p13, %p462_p10 }
  0x20   :  { %472 = shalt.err (!%p469_p0)
}
  0x21   :  { %48 = dma.hbm_to_vmem [thread:$0]  %s589_s3, 2048, %s43_s28, [#allocation6], %s500_s21, %s500_s21, %s501_s22  }
  0x22   :  { %493 = dma.done.wait [#allocation3], 64  }
  0x23   :  { %494 = vsyncadd [#allocation3], 4294967232 }
  0x24   :  { %495 = dma.done.wait [#allocation6], 6144  }
  0x25   :  { %496 = vsyncadd [#allocation6], 4294961152  ;;  %v504_v0 = vmov 0.0   ;;  %v92_v1 = vld [vmem:[#allocation5 + $0xf8] sm:$0xff]  ;;  %v91_v3 = vld [vmem:[#allocation5 + $0xf0] sm:$0xff]  ;;  %vm505_vm0 = vmmov 0   ;;  %v275_v57 = vlaneseq }
  0x26   :  { %366 = vmatprep.subr.mxu1 %v504_v0  ;;  %v76_v2 = vld [vmem:[#allocation5 + $0x78] sm:$0xff]  ;;  %314 = vmatprep.subr.mxu0 %v92_v1  ;;  %v75_v4 = vld [vmem:[#allocation5 + $0x70] sm:$0xff]  ;;  %v90_v5 = vld [vmem:[#allocation5 + $0xe8] sm:$0xff] }
  0x27   :  { %315 = vmatpush3.msra.mxu0 %v76_v2  ;;  %v74_v6 = vld [vmem:[#allocation5 + $0x68] sm:$0xff]  ;;  %v89_v7 = vld [vmem:[#allocation5 + $0xe0] sm:$0xff]  ;;  %v88_v9 = vld [vmem:[#allocation5 + $0xd8] sm:$0xff]  ;;  %398 = vmatprep.mubr.msk.f32.mxu1 %vm505_vm0, %v504_v0  ;;  %v276_v58 = vand.u32 127, %v275_v57 }
  0x28   :  { %316 = vmatprep.subr.mxu0 %v91_v3  ;;  %v73_v8 = vld [vmem:[#allocation5 + $0x60] sm:$0xff]  ;;  %v72_v10 = vld [vmem:[#allocation5 + $0x58] sm:$0xff]  ;;  %v87_v11 = vld [vmem:[#allocation5 + $0xd0] sm:$0xff] }
  0x29   :  { %317 = vmatpush3.msra.mxu0 %v75_v4  ;;  %v71_v12 = vld [vmem:[#allocation5 + $0x50] sm:$0xff]  ;;  %v86_v13 = vld [vmem:[#allocation5 + $0xc8] sm:$0xff]  ;;  %v547_v14 = vld.sshfl [vmem:[#allocation2] sm:$0x33 pattern:$0x76325410] }
  0x2a   :  { %318 = vmatprep.subr.mxu0 %v90_v5  ;;  %v70_v15 = vld [vmem:[#allocation5 + $0x48] sm:$0xff]  ;;  %v108_v16 = vcombine.high %v547_v14, %v547_v14  ;;  %v197_v17 = vld [vmem:[#allocation7 + $0x78] sm:$0xff]  ;;  %v85_v18 = vld [vmem:[#allocation5 + $0xc0] sm:$0xff]  ;;  %vm278_vm1 = vcmp.ge.s32.totalorder %v276_v58, 8  ;;  %vm279_vm2 = vcmp.lt.s32.totalorder %v276_v58, 16  ;;  %vm277_vm4 = vcmp.lt.s32.totalorder %v276_v58, 8 }
  0x2b   :  { %319 = vmatpush3.msra.mxu0 %v74_v6  ;;  %367 = vmatpush3.msra.mxu1 %v197_v17  ;;  %v196_v19 = vld [vmem:[#allocation7 + $0x70] sm:$0xff]  ;;  %v69_v20 = vld [vmem:[#allocation5 + $0x40] sm:$0xff]  ;;  %v84_v21 = vld [vmem:[#allocation5 + $0xb8] sm:$0xff] }
  0x2c   :  { %320 = vmatprep.subr.mxu0 %v89_v7  ;;  %175 = vmatprep.mubr.f32.mxu0 %v108_v16  ;;  %v195_v22 = vld [vmem:[#allocation7 + $0x68] sm:$0xff]  ;;  %v68_v23 = vld [vmem:[#allocation5 + $0x38] sm:$0xff]  ;;  %v83_v24 = vld [vmem:[#allocation5 + $0xb0] sm:$0xff] }
  0x2d   :  { %321 = vmatpush3.msra.mxu0 %v73_v8  ;;  %368 = vmatprep.subr.mxu1 %v504_v0  ;;  %v194_v25 = vld [vmem:[#allocation7 + $0x60] sm:$0xff]  ;;  %v67_v26 = vld [vmem:[#allocation5 + $0x30] sm:$0xff]  ;;  %v82_v27 = vld [vmem:[#allocation5 + $0xa8] sm:$0xff] }
  0x2e   :  { %322 = vmatprep.subr.mxu0 %v88_v9  ;;  %369 = vmatpush3.msra.mxu1 %v196_v19  ;;  %v193_v28 = vld [vmem:[#allocation7 + $0x58] sm:$0xff]  ;;  %v66_v29 = vld [vmem:[#allocation5 + $0x28] sm:$0xff]  ;;  %v81_v30 = vld [vmem:[#allocation5 + $0xa0] sm:$0xff] }
  0x2f   :  { %323 = vmatpush3.msra.mxu0 %v72_v10  ;;  %370 = vmatprep.subr.mxu1 %v504_v0  ;;  %v192_v31 = vld [vmem:[#allocation7 + $0x50] sm:$0xff]  ;;  %v65_v32 = vld [vmem:[#allocation5 + $0x20] sm:$0xff]  ;;  %v80_v33 = vld [vmem:[#allocation5 + $0x98] sm:$0xff] }
  0x30   :  { %324 = vmatprep.subr.mxu0 %v87_v11  ;;  %371 = vmatpush3.msra.mxu1 %v195_v22  ;;  %v191_v34 = vld [vmem:[#allocation7 + $0x48] sm:$0xff]  ;;  %v64_v35 = vld [vmem:[#allocation5 + $0x18] sm:$0xff]  ;;  %v79_v36 = vld [vmem:[#allocation5 + $0x90] sm:$0xff] }
  0x31   :  { %325 = vmatpush3.msra.mxu0 %v71_v12  ;;  %372 = vmatprep.subr.mxu1 %v504_v0  ;;  %v190_v37 = vld [vmem:[#allocation7 + $0x40] sm:$0xff]  ;;  %v63_v38 = vld [vmem:[#allocation5 + $0x10] sm:$0xff]  ;;  %v78_v39 = vld [vmem:[#allocation5 + $0x88] sm:$0xff] }
  0x32   :  { %326 = vmatprep.subr.mxu0 %v86_v13  ;;  %373 = vmatpush3.msra.mxu1 %v194_v25  ;;  %v189_v40 = vld [vmem:[#allocation7 + $0x38] sm:$0xff]  ;;  %v62_v41 = vld [vmem:[#allocation5 + $0x8] sm:$0xff]  ;;  %v77_v42 = vld [vmem:[#allocation5 + $0x80] sm:$0xff] }
  0x33   :  { %327 = vmatpush3.msra.mxu0 %v70_v15  ;;  %374 = vmatprep.subr.mxu1 %v504_v0  ;;  %v188_v43 = vld [vmem:[#allocation7 + $0x30] sm:$0xff]  ;;  %v61_v44 = vld [vmem:[#allocation5] sm:$0xff]  ;;  %v187_v45 = vld [vmem:[#allocation7 + $0x28] sm:$0xff] }
  0x34   :  { %328 = vmatprep.subr.mxu0 %v85_v18  ;;  %375 = vmatpush3.msra.mxu1 %v193_v28  ;;  %v186_v46 = vld [vmem:[#allocation7 + $0x20] sm:$0xff]  ;;  %v185_v47 = vld [vmem:[#allocation7 + $0x18] sm:$0xff]  ;;  %v184_v48 = vld [vmem:[#allocation7 + $0x10] sm:$0xff] }
  0x35   :  { %329 = vmatpush3.msra.mxu0 %v69_v20  ;;  %376 = vmatprep.subr.mxu1 %v504_v0  ;;  %v183_v49 = vld [vmem:[#allocation7 + $0x8] sm:$0xff]  ;;  %v182_v50 = vld [vmem:[#allocation7] sm:$0xff]  ;;  %v310_v52 = vld [vmem:[%s588_s2] ss:$0 sm:$0xff]  ;;  %s506_s2 = smov [#allocation8]  }
  0x36   :  { %330 = vmatprep.subr.mxu0 %v84_v21  ;;  %377 = vmatpush3.msra.mxu1 %v192_v31  ;;  %vm571_vm3 = vmand %vm278_vm1, %vm279_vm2  ;;  %v312_v60 = vld [vmem:[%s590_s4] ss:$0 sm:$0xff]  ;;  %s300_s11 = sshll.u32 %s506_s2, 4  ;;  %s301_s11 = int_to_ptr.vmem [resolvable:$true] %s300_s11 }
  0x37   :  { %331 = vmatpush3.msra.mxu0 %v68_v23  ;;  %378 = vmatprep.subr.mxu1 %v504_v0  ;;  %v281_v62 = vsel %vm571_vm3, 5.0, %v504_v0  ;;  %s473_s4 = scalar_lea.vmem %s301_s11, 32  ;;  %p478_p2 = scmp.lt.s32.totalorder %s301_s11, %s301_s11 }
  0x38   :  { %332 = vmatprep.subr.mxu0 %v83_v24  ;;  %379 = vmatpush3.msra.mxu1 %v191_v34  ;;  %p474_p1 = scmp.ne.s32.totalorder %s301_s11, %s473_s4  ;;  %p479_p3 = scmp.lt.s32.totalorder %s473_s4, %s473_s4 }
  0x39   :  { %333 = vmatpush3.msra.mxu0 %v67_v26  ;;  %380 = vmatprep.subr.mxu1 %v504_v0 }
  0x3a   :  { %334 = vmatprep.subr.mxu0 %v82_v27  ;;  %381 = vmatpush3.msra.mxu1 %v190_v37  ;;  %p480_p4 = por %p479_p3, %p478_p2 }
  0x3b   :  { %335 = vmatpush3.msra.mxu0 %v66_v29  ;;  %382 = vmatprep.subr.mxu1 %v504_v0 }
  0x3c   :  { %336 = vmatprep.subr.mxu0 %v81_v30  ;;  %383 = vmatpush3.msra.mxu1 %v189_v40  ;;  %p481_p5 = pnand %p480_p4, %p474_p1 }
  0x3d   :  { %337 = vmatpush3.msra.mxu0 %v65_v32  ;;  %384 = vmatprep.subr.mxu1 %v504_v0 }
  0x3e   :  { %338 = vmatprep.subr.mxu0 %v80_v33  ;;  %385 = vmatpush3.msra.mxu1 %v188_v43 }
  0x3f   :  { %339 = vmatpush3.msra.mxu0 %v64_v35  ;;  %386 = vmatprep.subr.mxu1 %v504_v0 }
  0x40   :  { %340 = vmatprep.subr.mxu0 %v79_v36  ;;  %387 = vmatpush3.msra.mxu1 %v187_v45 }
  0x41   :  { %341 = vmatpush3.msra.mxu0 %v63_v38  ;;  %388 = vmatprep.subr.mxu1 %v504_v0 }
  0x42   :  { %342 = vmatprep.subr.mxu0 %v78_v39  ;;  %389 = vmatpush3.msra.mxu1 %v186_v46 }
  0x43   :  { %343 = vmatpush3.msra.mxu0 %v62_v41  ;;  %390 = vmatprep.subr.mxu1 %v504_v0 }
  0x44   :  { %344 = vmatprep.subr.mxu0 %v77_v42  ;;  %391 = vmatpush3.msra.mxu1 %v185_v47 }
  0x45   :  { %345 = vmatpush3.msra.mxu0 %v61_v44  ;;  %392 = vmatprep.subr.mxu1 %v504_v0 }
  0x46   :  { %176 = vmatmul.mubr.f32.vlgmr.msra.gmra.mxu0 %v547_v14  ;;  %393 = vmatpush3.msra.mxu1 %v184_v48 }
  0x47   :  { %394 = vmatprep.subr.mxu1 %v504_v0 }
  0x48   :  { %395 = vmatpush3.msra.mxu1 %v183_v49 }
  0x49   :  { %396 = vmatprep.subr.mxu1 %v504_v0 }
  0x4a   :  { %397 = vmatpush3.msra.mxu1 %v182_v50 }
 0x106   :  { %v346_v51 = vpop.f32.mrf.mxu0 }
 0x108   :  { %v347_v53 = vpop.f32.mrf.mxu0 }
 0x109   :  { %v348_v54 = vadd.f32 %v347_v53, %v346_v51 }
 0x10b   :  { %v178_v55 = vadd.f32 %v348_v54, %v310_v52 }
 0x10d   :  { %v181_v56 = vmax.f32 %v178_v55, 0.0 }
 0x10f   :  { %399 = vmatmul.mubr.f32.vlgmr.msra.gmra.mxu1 %v181_v56 }
 0x1cf   :  { %v271_v61 = vpop.f32.mrf.mxu1 }
 0x1d0   :  { %v272_v63 = vadd.f32 %v312_v60, %v271_v61 }
 0x1d1   :  { %v400_v1 = vpop.f32.mrf.mxu1 }
 0x1d2   :  { %v282_v2 = vsub.f32 %v272_v63, %v281_v62 }
 0x1d4   :  { %v313_v3 = vmul.f32 -1.442695, %v282_v2 }
 0x1d6   :  { %409 = vpow2.f32 %v313_v3 }
 0x1e3   :  { %v410_v4 = vpop.eup %409 }
 0x1e4   :  { %v286_v5 = vadd.f32 1.0, %v410_v4 }
 0x1e6   :  { %411 = vrcp.f32 %v286_v5 }
 0x1f3   :  { %v412_v6 = vpop.eup %411 }
 0x1f4   :  { %v289_v7 = vmul.f32 0.98, %v412_v6  ;;  %v291_v9 = vsel %vm571_vm3, %v412_v6, %v272_v63 }
 0x1f6   :  { %v290_v8 = vadd.f32 0.01, %v289_v7 }
 0x1f8   :  { %v292_v10 = vsel %vm277_vm4, %v290_v8, %v291_v9 }
 0x1f9   :  { %293 = vst [vmem:[#allocation8] sm:$0x3] %v292_v10 }
 0x1fa   :  { %484 = shalt.err (!%p481_p5)
}
 0x1fb   :  { %303 = dma.vmem_to_hbm [thread:$0]  %s301_s11, 32, %s591_s5, [#allocation4]  }
 0x1fc   :  { %497 = dma.done.wait [#allocation4], 32  }
 0x1fd   :  { %498 = vsyncadd [#allocation4], 4294967264 }
 0x1fe   :  { %307 = vsyncpa [#allocation3], 1 }
 0x1ff   :  { %308 = vsyncpa [#allocation6], 1 }
 0x200   :  { %309 = vsyncpa [#allocation4], 1 }

</bundles_post_ra>
